<compile_context>
chip_gen: v5e
topology: v5e:2x2
jax: 0.10.0
libtpu: 0.0.40
codegen_flags: <defaults>
</compile_context>

<pallas_src>
import math

import jax
import jax.numpy as jnp
import numpy as np
from jax.experimental import pallas as pl
from jax.experimental.pallas import tpu as pltpu

# ---------------- config (small synthetic shapes) ----------------
B = 2          # batch
S = 8          # (padded) protein sequence length
E = 32         # args.seq_embed_dim
NHEADS = 4     # args.seq_self_attn_nheads
ROT = E // 4   # RotaryEmbedding(dim=E//4)
H = 32         # MPN hidden_size (encoder output width)
HF = 32        # args.ffn_hidden_size
OUT = 1        # relative_output_size * num_tasks
DIN = E + H    # readout input width
BS = B * S     # folded batch*seq rows

# ---------------- parameter-slab layout (one DMA for everything static) ----------------
# All row offsets are multiples of 8 (sublane-aligned); width = 2*E = 64 lanes.
R_WQK = 0                 # (E, 2E)  MHA in_proj weights for Q and K (fused)
R_WV = R_WQK + E          # (E, E)   MHA in_proj weights for V
R_WOUT = R_WV + E         # (E, E)   MHA out_proj weight
R_APW1 = R_WOUT + E       # (E, E)   attentive-pool linear1 weight
R_APW2 = R_APW1 + E       # (E, 1)   attentive-pool linear2 weight
R_FW1A = R_APW2 + E       # (E, HF)  readout FFN W1 rows for pooled part
R_FW1B = R_FW1A + E       # (H, HF)  readout FFN W1 rows for encodings part
R_FW2 = R_FW1B + H        # (HF, OUT) readout FFN W2
R_PROT = R_FW2 + HF       # (E, E)   rotate_half as a (padded) permutation matrix
R_COS = R_PROT + E        # (BS, E)  rotary cos (cos=1 beyond ROT), tiled over batch
R_SIN = R_COS + BS        # (BS, E)  rotary sin (sin=0 beyond ROT), tiled over batch
R_MASK = R_SIN + BS       # (BS, BS) block-diagonal additive attention mask (0 / -1e30)
R_BIAS = R_MASK + BS      # 7 bias rows (one per bias vector/scalar)
SLAB_ROWS = R_BIAS + 8
SLAB_COLS = 2 * E


# ---------------- Pallas kernel: whole batch in one invocation ----------------
def molecule_kernel(seq_ref, enc_ref, slab_ref, out_ref):
    x = seq_ref[...]                                            # (BS, E)

    # ---- rotary embedding (computed once; q and k are identical rotations of x) ----
    cosf = slab_ref[R_COS:R_COS + BS, 0:E]
    sinf = slab_ref[R_SIN:R_SIN + BS, 0:E]
    p_rot = slab_ref[R_PROT:R_PROT + E, 0:E]
    half = jnp.dot(x, p_rot, preferred_element_type=jnp.float32)  # rotate_half(x) on first ROT chans
    rot = x * cosf + half * sinf                                  # (BS, E)

    # ---- fused Q/K in-projection + V projection ----
    w_qk = slab_ref[R_WQK:R_WQK + E, 0:2 * E]
    b_qk = slab_ref[R_BIAS + 0:R_BIAS + 1, 0:2 * E]
    qk = jnp.dot(rot, w_qk, preferred_element_type=jnp.float32) + b_qk     # (BS, 2E)
    w_v = slab_ref[R_WV:R_WV + E, 0:E]
    b_v = slab_ref[R_BIAS + 1:R_BIAS + 2, 0:E]
    V = jnp.dot(x, w_v, preferred_element_type=jnp.float32) + b_v          # (BS, E)

    # ---- multi-head attention over the folded batch (block-diagonal mask) ----
    attn_bias = slab_ref[R_MASK:R_MASK + BS, 0:BS]              # 0 within sample, -1e30 across
    w_out = slab_ref[R_WOUT:R_WOUT + E, 0:E]
    b_out = slab_ref[R_BIAS + 2:R_BIAS + 3, 0:E]

    hd = E // NHEADS
    scale = 1.0 / math.sqrt(hd)
    attn = None
    for h in range(NHEADS):                                     # static unrolled head loop
        Qh = qk[:, h * hd:(h + 1) * hd]
        Kh = qk[:, E + h * hd:E + (h + 1) * hd]
        Vh = V[:, h * hd:(h + 1) * hd]
        sc = jnp.dot(Qh, Kh.T, preferred_element_type=jnp.float32) * scale + attn_bias
        sc = sc - jnp.max(sc, axis=-1, keepdims=True)
        p = jnp.exp(sc)
        p = p * pl.reciprocal(jnp.sum(p, axis=-1, keepdims=True), approx=True)
        ctx_h = jnp.dot(p, Vh, preferred_element_type=jnp.float32)          # (BS, hd)
        # accumulate out-projection per head (sublane-aligned weight row slice; no lane concat)
        part = jnp.dot(ctx_h, w_out[h * hd:(h + 1) * hd, :],
                       preferred_element_type=jnp.float32)                  # (BS, E)
        attn = part if attn is None else attn + part
    attn = attn + b_out                                                     # (BS, E)

    # ---- attentive pooling (per-sample softmax over the sequence dim) ----
    # NOTE: pad positions are NOT masked, matching the original PyTorch model
    # (no key_padding_mask, no mask in AttentivePooling).
    ap_w1 = slab_ref[R_APW1:R_APW1 + E, 0:E]
    ap_b1 = slab_ref[R_BIAS + 3:R_BIAS + 4, 0:E]
    ap_w2 = slab_ref[R_APW2:R_APW2 + E, 0:1]
    ap_b2 = slab_ref[R_BIAS + 4:R_BIAS + 5, 0:1]
    h1 = jnp.tanh(jnp.dot(attn, ap_w1, preferred_element_type=jnp.float32) + ap_b1)
    sc2 = jnp.dot(h1, ap_w2, preferred_element_type=jnp.float32) + ap_b2    # (BS, 1)

    pooled_rows = []
    for b in range(B):                                          # static, sublane-aligned slices
        sc_b = sc2[b * S:(b + 1) * S, :]                        # (S, 1)
        a_b = attn[b * S:(b + 1) * S, :]                        # (S, E)
        m = jnp.max(sc_b, axis=0, keepdims=True)
        e = jnp.exp(sc_b - m)
        wgt = e * pl.reciprocal(jnp.sum(e, axis=0, keepdims=True), approx=True)
        pooled_rows.append(jnp.sum(wgt * a_b, axis=0, keepdims=True))       # (1, E)
    pooled = jnp.concatenate(pooled_rows, axis=0)               # (B, E)

    # ---- readout FFN, batched over B; first layer split to avoid the lane concat ----
    enc = enc_ref[...]                                          # (B, H)
    ff_w1a = slab_ref[R_FW1A:R_FW1A + E, 0:HF]
    ff_w1b = slab_ref[R_FW1B:R_FW1B + H, 0:HF]
    ff_b1 = slab_ref[R_BIAS + 5:R_BIAS + 6, 0:HF]
    ff_w2 = slab_ref[R_FW2:R_FW2 + HF, 0:OUT]
    ff_b2 = slab_ref[R_BIAS + 6:R_BIAS + 7, 0:OUT]
    h2 = jnp.maximum(
        jnp.dot(pooled, ff_w1a, preferred_element_type=jnp.float32)
        + jnp.dot(enc, ff_w1b, preferred_element_type=jnp.float32)
        + ff_b1, 0.0)                                           # (B, HF)
    out_ref[...] = jnp.dot(h2, ff_w2, preferred_element_type=jnp.float32) + ff_b2   # (B, OUT)


# ---------------- wrapper (glue: embedding lookup, rotary tables, slab packing) ----------------
def make_rotary_tables(seq_len, rot_dim):
    inv_freq = 1.0 / (10000.0 ** (jnp.arange(0, rot_dim, 2, dtype=jnp.float32) / rot_dim))
    freqs = jnp.arange(seq_len, dtype=jnp.float32)[:, None] * inv_freq[None, :]   # (S, rot/2)
    freqs = jnp.repeat(freqs, 2, axis=-1)                                         # interleaved (S, rot)
    cos, sin = jnp.cos(freqs), jnp.sin(freqs)
    # rotate_half as a matmul:  (t @ P)[:, 2i] = -t[:, 2i+1],  (t @ P)[:, 2i+1] = t[:, 2i]
    P = np.zeros((rot_dim, rot_dim), np.float32)
    for i in range(rot_dim // 2):
        P[2 * i + 1, 2 * i] = -1.0
        P[2 * i, 2 * i + 1] = 1.0
    return cos, sin, jnp.asarray(P)


def build_param_slab(params):
    cos, sin, P = make_rotary_tables(S, ROT)
    # extend rotary to full width: cos=1, sin=0 for un-rotated channels -> no concat in the kernel
    cos_f = jnp.tile(jnp.concatenate([cos, jnp.ones((S, E - ROT), jnp.float32)], axis=-1), (B, 1))
    sin_f = jnp.tile(jnp.concatenate([sin, jnp.zeros((S, E - ROT), jnp.float32)], axis=-1), (B, 1))
    P_full = jnp.zeros((E, E), jnp.float32).at[:ROT, :ROT].set(P)
    # block-diagonal additive attention mask for the folded batch
    sample_id = np.repeat(np.arange(B), S)
    attn_mask = np.where(sample_id[:, None] == sample_id[None, :], 0.0, -1e30).astype(np.float32)

    slab = jnp.zeros((SLAB_ROWS, SLAB_COLS), jnp.float32)
    slab = slab.at[R_WQK:R_WQK + E, 0:2 * E].set(params["in_w"][:, 0:2 * E])
    slab = slab.at[R_WV:R_WV + E, 0:E].set(params["in_w"][:, 2 * E:3 * E])
    slab = slab.at[R_WOUT:R_WOUT + E, 0:E].set(params["out_w"])
    slab = slab.at[R_APW1:R_APW1 + E, 0:E].set(params["ap_w1"])
    slab = slab.at[R_APW2:R_APW2 + E, 0:1].set(params["ap_w2"])
    slab = slab.at[R_FW1A:R_FW1A + E, 0:HF].set(params["ff_w1"][0:E])
    slab = slab.at[R_FW1B:R_FW1B + H, 0:HF].set(params["ff_w1"][E:E + H])
    slab = slab.at[R_FW2:R_FW2 + HF, 0:OUT].set(params["ff_w2"])
    slab = slab.at[R_PROT:R_PROT + E, 0:E].set(P_full)
    slab = slab.at[R_COS:R_COS + BS, 0:E].set(cos_f)
    slab = slab.at[R_SIN:R_SIN + BS, 0:E].set(sin_f)
    slab = slab.at[R_MASK:R_MASK + BS, 0:BS].set(jnp.asarray(attn_mask))
    slab = slab.at[R_BIAS + 0, 0:2 * E].set(params["in_b"][0, 0:2 * E])
    slab = slab.at[R_BIAS + 1, 0:E].set(params["in_b"][0, 2 * E:3 * E])
    slab = slab.at[R_BIAS + 2, 0:E].set(params["out_b"][0])
    slab = slab.at[R_BIAS + 3, 0:E].set(params["ap_b1"][0])
    slab = slab.at[R_BIAS + 4, 0:1].set(params["ap_b2"][0])
    slab = slab.at[R_BIAS + 5, 0:HF].set(params["ff_b1"][0])
    slab = slab.at[R_BIAS + 6, 0:OUT].set(params["ff_b2"][0])
    return slab


def molecule_model_forward(tokens, encodings, params):
    seq_emb = params["embed"][tokens].reshape(BS, E)   # embedding gather done in wrapper (XLA)
    slab = build_param_slab(params)

    out = pl.pallas_call(
        molecule_kernel,
        out_shape=jax.ShapeDtypeStruct((B, OUT), jnp.float32),
        grid_spec=pltpu.PrefetchScalarGridSpec(
            num_scalar_prefetch=0,
            grid=(1,),                                       # whole batch folded into one step
            in_specs=[
                pl.BlockSpec((BS, E), lambda i: (0, 0)),            # embedded sequences (B folded)
                pl.BlockSpec((B, H), lambda i: (0, 0)),             # MPN encodings
                pl.BlockSpec((SLAB_ROWS, SLAB_COLS), lambda i: (0, 0)),   # packed parameter slab
            ],
            out_specs=pl.BlockSpec((B, OUT), lambda i: (0, 0)),
        ),
        compiler_params=pltpu.CompilerParams(dimension_semantics=("arbitrary",)),
    )(seq_emb, encodings, slab)
    return out


# ---------------- pure-JAX reference (same math, batched) ----------------
def reference_forward(tokens, encodings, params):
    seq_emb = params["embed"][tokens]
    cos, sin, P = make_rotary_tables(S, ROT)

    def rotate(t):
        tr, rest = t[..., :ROT], t[..., ROT:]
        half = jnp.einsum("bsr,rk->bsk", tr, P)
        return jnp.concatenate([tr * cos + half * sin, rest], axis=-1)

    q, k, v = rotate(seq_emb), rotate(seq_emb), seq_emb
    Q = q @ params["in_w"][:, 0:E] + params["in_b"][0, 0:E]
    K = k @ params["in_w"][:, E:2 * E] + params["in_b"][0, E:2 * E]
    V = v @ params["in_w"][:, 2 * E:3 * E] + params["in_b"][0, 2 * E:3 * E]
    hd = E // NHEADS
    Qh = Q.reshape(B, S, NHEADS, hd)
    Kh = K.reshape(B, S, NHEADS, hd)
    Vh = V.reshape(B, S, NHEADS, hd)
    sc = jnp.einsum("bqhd,bkhd->bhqk", Qh, Kh) / math.sqrt(hd)
    p = jax.nn.softmax(sc, axis=-1)
    ctx = jnp.einsum("bhqk,bkhd->bqhd", p, Vh).reshape(B, S, E)
    attn_out = ctx @ params["out_w"] + params["out_b"][0]

    h1 = jnp.tanh(attn_out @ params["ap_w1"] + params["ap_b1"][0])
    sc2 = h1 @ params["ap_w2"] + params["ap_b2"][0]                 # (B, S, 1)
    w = jax.nn.softmax(sc2, axis=1)
    pooled = jnp.sum(w * attn_out, axis=1)                          # (B, E)

    tot = jnp.concatenate([pooled, encodings], axis=-1)
    h2 = jnp.maximum(tot @ params["ff_w1"] + params["ff_b1"][0], 0.0)
    return h2 @ params["ff_w2"] + params["ff_b2"][0]


# ---------------- deterministic parameter init ----------------
def init_params(key):
    ks = jax.random.split(key, 16)
    n = lambda k, shape, s=0.1: (jax.random.normal(k, shape, jnp.float32) * s)
    embed = n(ks[0], (21, E), 0.5)
    embed = embed.at[20].set(0.0)                                   # padding_idx=20
    return {
        "embed": embed,
        "in_w": n(ks[1], (E, 3 * E)), "in_b": n(ks[2], (1, 3 * E)),
        "out_w": n(ks[3], (E, E)),    "out_b": n(ks[4], (1, E)),
        "ap_w1": n(ks[5], (E, E)),    "ap_b1": n(ks[6], (1, E)),
        "ap_w2": n(ks[7], (E, 1)),    "ap_b2": n(ks[8], (1, 1)),
        "ff_w1": n(ks[9], (DIN, HF)), "ff_b1": n(ks[10], (1, HF)),
        "ff_w2": n(ks[11], (HF, OUT)), "ff_b2": n(ks[12], (1, OUT)),
    }


if __name__ == "__main__":
    key = jax.random.PRNGKey(0)
    k_tok, k_enc, k_par = jax.random.split(key, 3)

    params = init_params(k_par)
    tokens = jax.random.randint(k_tok, (B, S), 0, 20, dtype=jnp.int32)
    tokens = tokens.at[1, S - 2:].set(20)                 # simulate pad_sequence padding
    encodings = jax.random.normal(k_enc, (B, H), jnp.float32) * 0.1   # stands in for MPN output

    out = molecule_model_forward(tokens, encodings, params)
    out = jax.block_until_ready(out)

    ref = reference_forward(tokens, encodings, params)
    # slightly relaxed tolerance: the kernel uses pl.reciprocal(approx=True) for the
    # softmax / pooling normalizations (EUP approximate reciprocal).
    np.testing.assert_allclose(np.asarray(out), np.asarray(ref), rtol=5e-3, atol=1e-4)
    print("KERNEL_OK")
</pallas_src>

<mosaic_0001>
module attributes {stable_mosaic.version = 11 : i64} {
  func.func @molecule_kernel(%arg0: i32, %arg1: memref<16x32xf32, #tpu.memory_space<vmem>>, %arg2: memref<2x32xf32, #tpu.memory_space<vmem>>, %arg3: memref<344x64xf32, #tpu.memory_space<vmem>>, %arg4: memref<2x1xf32, #tpu.memory_space<vmem>>) attributes {dimension_semantics = [#tpu.dimension_semantics<arbitrary>], iteration_bounds = array<i64: 1>, scalar_prefetch = 0 : i64, scratch_operands = 0 : i64, tpu.core_type = #tpu.core_type<tc>, window_params = [{pipeline_mode = #tpu.pipeline_mode<synchronous>, transform_indices = @transform_0, window_bounds = array<i64: 16, 32>}, {pipeline_mode = #tpu.pipeline_mode<synchronous>, transform_indices = @transform_1, window_bounds = array<i64: 2, 32>}, {pipeline_mode = #tpu.pipeline_mode<synchronous>, transform_indices = @transform_2, window_bounds = array<i64: 344, 64>}, {pipeline_mode = #tpu.pipeline_mode<synchronous>, transform_indices = @transform_3, window_bounds = array<i64: 2, 1>}]} {
    %c0 = arith.constant 0 : index
    %c0_0 = arith.constant 0 : index
    %0 = vector.load %arg1[%c0, %c0_0] : memref<16x32xf32, #tpu.memory_space<vmem>>, vector<16x32xf32>
    %c288 = arith.constant 288 : index
    %c0_1 = arith.constant 0 : index
    %1 = vector.load %arg3[%c288, %c0_1] : memref<344x64xf32, #tpu.memory_space<vmem>>, vector<16x32xf32>
    %c304 = arith.constant 304 : index
    %c0_2 = arith.constant 0 : index
    %2 = vector.load %arg3[%c304, %c0_2] : memref<344x64xf32, #tpu.memory_space<vmem>>, vector<16x32xf32>
    %c256 = arith.constant 256 : index
    %c0_3 = arith.constant 0 : index
    %3 = vector.load %arg3[%c256, %c0_3] : memref<344x64xf32, #tpu.memory_space<vmem>>, vector<32x32xf32>
    %cst = arith.constant dense<0.000000e+00> : vector<16x32xf32>
    %4 = tpu.matmul %0, %3, %cst {dimension_numbers = #tpu.dot_dimension_numbers<[1], [0], [0], [1], [0, 0, 1, 1], [], []>} : vector<16x32xf32>, vector<32x32xf32>, vector<16x32xf32> -> vector<16x32xf32>
    %5 = arith.mulf %0, %1 : vector<16x32xf32>
    %6 = arith.mulf %4, %2 : vector<16x32xf32>
    %7 = arith.addf %5, %6 : vector<16x32xf32>
    %c0_4 = arith.constant 0 : index
    %c0_5 = arith.constant 0 : index
    %8 = vector.load %arg3[%c0_4, %c0_5] : memref<344x64xf32, #tpu.memory_space<vmem>>, vector<32x64xf32>
    %c336 = arith.constant 336 : index
    %c0_6 = arith.constant 0 : index
    %9 = vector.load %arg3[%c336, %c0_6] : memref<344x64xf32, #tpu.memory_space<vmem>>, vector<1x64xf32>
    %cst_7 = arith.constant dense<0.000000e+00> : vector<16x64xf32>
    %10 = tpu.matmul %7, %8, %cst_7 {dimension_numbers = #tpu.dot_dimension_numbers<[1], [0], [0], [1], [0, 0, 1, 1], [], []>} : vector<16x32xf32>, vector<32x64xf32>, vector<16x64xf32> -> vector<16x64xf32>
    %11 = vector.broadcast %9 : vector<1x64xf32> to vector<16x64xf32>
    %12 = arith.addf %10, %11 : vector<16x64xf32>
    %c32 = arith.constant 32 : index
    %c0_8 = arith.constant 0 : index
    %13 = vector.load %arg3[%c32, %c0_8] : memref<344x64xf32, #tpu.memory_space<vmem>>, vector<32x32xf32>
    %c337 = arith.constant 337 : index
    %c0_9 = arith.constant 0 : index
    %14 = vector.load %arg3[%c337, %c0_9] : memref<344x64xf32, #tpu.memory_space<vmem>>, vector<1x32xf32>
    %cst_10 = arith.constant dense<0.000000e+00> : vector<16x32xf32>
    %15 = tpu.matmul %0, %13, %cst_10 {dimension_numbers = #tpu.dot_dimension_numbers<[1], [0], [0], [1], [0, 0, 1, 1], [], []>} : vector<16x32xf32>, vector<32x32xf32>, vector<16x32xf32> -> vector<16x32xf32>
    %16 = vector.broadcast %14 : vector<1x32xf32> to vector<16x32xf32>
    %17 = arith.addf %15, %16 : vector<16x32xf32>
    %c320 = arith.constant 320 : index
    %c0_11 = arith.constant 0 : index
    %18 = vector.load %arg3[%c320, %c0_11] : memref<344x64xf32, #tpu.memory_space<vmem>>, vector<16x16xf32>
    %c64 = arith.constant 64 : index
    %c0_12 = arith.constant 0 : index
    %19 = vector.load %arg3[%c64, %c0_12] : memref<344x64xf32, #tpu.memory_space<vmem>>, vector<32x32xf32>
    %c338 = arith.constant 338 : index
    %c0_13 = arith.constant 0 : index
    %20 = vector.load %arg3[%c338, %c0_13] : memref<344x64xf32, #tpu.memory_space<vmem>>, vector<1x32xf32>
    %21 = vector.extract_strided_slice %12 {offsets = [0, 0], sizes = [16, 8], strides = [1, 1]} : vector<16x64xf32> to vector<16x8xf32>
    %22 = vector.extract_strided_slice %12 {offsets = [0, 32], sizes = [16, 8], strides = [1, 1]} : vector<16x64xf32> to vector<16x8xf32>
    %23 = vector.extract_strided_slice %17 {offsets = [0, 0], sizes = [16, 8], strides = [1, 1]} : vector<16x32xf32> to vector<16x8xf32>
    %24 = tpu.transpose %22, [1, 0] : vector<16x8xf32> -> vector<8x16xf32>
    %cst_14 = arith.constant dense<0.000000e+00> : vector<16x16xf32>
    %25 = tpu.matmul %21, %24, %cst_14 {dimension_numbers = #tpu.dot_dimension_numbers<[1], [0], [0], [1], [0, 0, 1, 1], [], []>} : vector<16x8xf32>, vector<8x16xf32>, vector<16x16xf32> -> vector<16x16xf32>
    %cst_15 = arith.constant 0.353553385 : f32
    %26 = vector.broadcast %cst_15 : f32 to vector<16x16xf32>
    %27 = arith.mulf %25, %26 : vector<16x16xf32>
    %28 = arith.addf %27, %18 : vector<16x16xf32>
    %cst_16 = arith.constant dense<0xFF800000> : vector<16xf32>
    %29 = vector.multi_reduction <maximumf>, %28, %cst_16 [1] : vector<16x16xf32> to vector<16xf32>
    %30 = vector.shape_cast %29 : vector<16xf32> to vector<16x1xf32>
    %31 = vector.broadcast %30 : vector<16x1xf32> to vector<16x16xf32>
    %32 = arith.subf %28, %31 : vector<16x16xf32>
    %33 = math.exp %32 : vector<16x16xf32>
    %cst_17 = arith.constant dense<0.000000e+00> : vector<16xf32>
    %34 = vector.multi_reduction <add>, %33, %cst_17 [1] : vector<16x16xf32> to vector<16xf32>
    %35 = vector.shape_cast %34 : vector<16xf32> to vector<16x1xf32>
    %36 = tpu.reciprocal %35 {approx = true} : vector<16x1xf32> -> vector<16x1xf32>
    %37 = vector.broadcast %36 : vector<16x1xf32> to vector<16x16xf32>
    %38 = arith.mulf %33, %37 : vector<16x16xf32>
    %cst_18 = arith.constant dense<0.000000e+00> : vector<16x8xf32>
    %39 = tpu.matmul %38, %23, %cst_18 {dimension_numbers = #tpu.dot_dimension_numbers<[1], [0], [0], [1], [0, 0, 1, 1], [], []>} : vector<16x16xf32>, vector<16x8xf32>, vector<16x8xf32> -> vector<16x8xf32>
    %40 = vector.extract_strided_slice %19 {offsets = [0, 0], sizes = [8, 32], strides = [1, 1]} : vector<32x32xf32> to vector<8x32xf32>
    %cst_19 = arith.constant dense<0.000000e+00> : vector<16x32xf32>
    %41 = tpu.matmul %39, %40, %cst_19 {dimension_numbers = #tpu.dot_dimension_numbers<[1], [0], [0], [1], [0, 0, 1, 1], [], []>} : vector<16x8xf32>, vector<8x32xf32>, vector<16x32xf32> -> vector<16x32xf32>
    %42 = vector.extract_strided_slice %12 {offsets = [0, 8], sizes = [16, 8], strides = [1, 1]} : vector<16x64xf32> to vector<16x8xf32>
    %43 = vector.extract_strided_slice %12 {offsets = [0, 40], sizes = [16, 8], strides = [1, 1]} : vector<16x64xf32> to vector<16x8xf32>
    %44 = vector.extract_strided_slice %17 {offsets = [0, 8], sizes = [16, 8], strides = [1, 1]} : vector<16x32xf32> to vector<16x8xf32>
    %45 = tpu.transpose %43, [1, 0] : vector<16x8xf32> -> vector<8x16xf32>
    %cst_20 = arith.constant dense<0.000000e+00> : vector<16x16xf32>
    %46 = tpu.matmul %42, %45, %cst_20 {dimension_numbers = #tpu.dot_dimension_numbers<[1], [0], [0], [1], [0, 0, 1, 1], [], []>} : vector<16x8xf32>, vector<8x16xf32>, vector<16x16xf32> -> vector<16x16xf32>
    %cst_21 = arith.constant 0.353553385 : f32
    %47 = vector.broadcast %cst_21 : f32 to vector<16x16xf32>
    %48 = arith.mulf %46, %47 : vector<16x16xf32>
    %49 = arith.addf %48, %18 : vector<16x16xf32>
    %cst_22 = arith.constant dense<0xFF800000> : vector<16xf32>
    %50 = vector.multi_reduction <maximumf>, %49, %cst_22 [1] : vector<16x16xf32> to vector<16xf32>
    %51 = vector.shape_cast %50 : vector<16xf32> to vector<16x1xf32>
    %52 = vector.broadcast %51 : vector<16x1xf32> to vector<16x16xf32>
    %53 = arith.subf %49, %52 : vector<16x16xf32>
    %54 = math.exp %53 : vector<16x16xf32>
    %cst_23 = arith.constant dense<0.000000e+00> : vector<16xf32>
    %55 = vector.multi_reduction <add>, %54, %cst_23 [1] : vector<16x16xf32> to vector<16xf32>
    %56 = vector.shape_cast %55 : vector<16xf32> to vector<16x1xf32>
    %57 = tpu.reciprocal %56 {approx = true} : vector<16x1xf32> -> vector<16x1xf32>
    %58 = vector.broadcast %57 : vector<16x1xf32> to vector<16x16xf32>
    %59 = arith.mulf %54, %58 : vector<16x16xf32>
    %cst_24 = arith.constant dense<0.000000e+00> : vector<16x8xf32>
    %60 = tpu.matmul %59, %44, %cst_24 {dimension_numbers = #tpu.dot_dimension_numbers<[1], [0], [0], [1], [0, 0, 1, 1], [], []>} : vector<16x16xf32>, vector<16x8xf32>, vector<16x8xf32> -> vector<16x8xf32>
    %61 = vector.extract_strided_slice %19 {offsets = [8, 0], sizes = [8, 32], strides = [1, 1]} : vector<32x32xf32> to vector<8x32xf32>
    %cst_25 = arith.constant dense<0.000000e+00> : vector<16x32xf32>
    %62 = tpu.matmul %60, %61, %cst_25 {dimension_numbers = #tpu.dot_dimension_numbers<[1], [0], [0], [1], [0, 0, 1, 1], [], []>} : vector<16x8xf32>, vector<8x32xf32>, vector<16x32xf32> -> vector<16x32xf32>
    %63 = arith.addf %41, %62 : vector<16x32xf32>
    %64 = vector.extract_strided_slice %12 {offsets = [0, 16], sizes = [16, 8], strides = [1, 1]} : vector<16x64xf32> to vector<16x8xf32>
    %65 = vector.extract_strided_slice %12 {offsets = [0, 48], sizes = [16, 8], strides = [1, 1]} : vector<16x64xf32> to vector<16x8xf32>
    %66 = vector.extract_strided_slice %17 {offsets = [0, 16], sizes = [16, 8], strides = [1, 1]} : vector<16x32xf32> to vector<16x8xf32>
    %67 = tpu.transpose %65, [1, 0] : vector<16x8xf32> -> vector<8x16xf32>
    %cst_26 = arith.constant dense<0.000000e+00> : vector<16x16xf32>
    %68 = tpu.matmul %64, %67, %cst_26 {dimension_numbers = #tpu.dot_dimension_numbers<[1], [0], [0], [1], [0, 0, 1, 1], [], []>} : vector<16x8xf32>, vector<8x16xf32>, vector<16x16xf32> -> vector<16x16xf32>
    %cst_27 = arith.constant 0.353553385 : f32
    %69 = vector.broadcast %cst_27 : f32 to vector<16x16xf32>
    %70 = arith.mulf %68, %69 : vector<16x16xf32>
    %71 = arith.addf %70, %18 : vector<16x16xf32>
    %cst_28 = arith.constant dense<0xFF800000> : vector<16xf32>
    %72 = vector.multi_reduction <maximumf>, %71, %cst_28 [1] : vector<16x16xf32> to vector<16xf32>
    %73 = vector.shape_cast %72 : vector<16xf32> to vector<16x1xf32>
    %74 = vector.broadcast %73 : vector<16x1xf32> to vector<16x16xf32>
    %75 = arith.subf %71, %74 : vector<16x16xf32>
    %76 = math.exp %75 : vector<16x16xf32>
    %cst_29 = arith.constant dense<0.000000e+00> : vector<16xf32>
    %77 = vector.multi_reduction <add>, %76, %cst_29 [1] : vector<16x16xf32> to vector<16xf32>
    %78 = vector.shape_cast %77 : vector<16xf32> to vector<16x1xf32>
    %79 = tpu.reciprocal %78 {approx = true} : vector<16x1xf32> -> vector<16x1xf32>
    %80 = vector.broadcast %79 : vector<16x1xf32> to vector<16x16xf32>
    %81 = arith.mulf %76, %80 : vector<16x16xf32>
    %cst_30 = arith.constant dense<0.000000e+00> : vector<16x8xf32>
    %82 = tpu.matmul %81, %66, %cst_30 {dimension_numbers = #tpu.dot_dimension_numbers<[1], [0], [0], [1], [0, 0, 1, 1], [], []>} : vector<16x16xf32>, vector<16x8xf32>, vector<16x8xf32> -> vector<16x8xf32>
    %83 = vector.extract_strided_slice %19 {offsets = [16, 0], sizes = [8, 32], strides = [1, 1]} : vector<32x32xf32> to vector<8x32xf32>
    %cst_31 = arith.constant dense<0.000000e+00> : vector<16x32xf32>
    %84 = tpu.matmul %82, %83, %cst_31 {dimension_numbers = #tpu.dot_dimension_numbers<[1], [0], [0], [1], [0, 0, 1, 1], [], []>} : vector<16x8xf32>, vector<8x32xf32>, vector<16x32xf32> -> vector<16x32xf32>
    %85 = arith.addf %63, %84 : vector<16x32xf32>
    %86 = vector.extract_strided_slice %12 {offsets = [0, 24], sizes = [16, 8], strides = [1, 1]} : vector<16x64xf32> to vector<16x8xf32>
    %87 = vector.extract_strided_slice %12 {offsets = [0, 56], sizes = [16, 8], strides = [1, 1]} : vector<16x64xf32> to vector<16x8xf32>
    %88 = vector.extract_strided_slice %17 {offsets = [0, 24], sizes = [16, 8], strides = [1, 1]} : vector<16x32xf32> to vector<16x8xf32>
    %89 = tpu.transpose %87, [1, 0] : vector<16x8xf32> -> vector<8x16xf32>
    %cst_32 = arith.constant dense<0.000000e+00> : vector<16x16xf32>
    %90 = tpu.matmul %86, %89, %cst_32 {dimension_numbers = #tpu.dot_dimension_numbers<[1], [0], [0], [1], [0, 0, 1, 1], [], []>} : vector<16x8xf32>, vector<8x16xf32>, vector<16x16xf32> -> vector<16x16xf32>
    %cst_33 = arith.constant 0.353553385 : f32
    %91 = vector.broadcast %cst_33 : f32 to vector<16x16xf32>
    %92 = arith.mulf %90, %91 : vector<16x16xf32>
    %93 = arith.addf %92, %18 : vector<16x16xf32>
    %cst_34 = arith.constant dense<0xFF800000> : vector<16xf32>
    %94 = vector.multi_reduction <maximumf>, %93, %cst_34 [1] : vector<16x16xf32> to vector<16xf32>
    %95 = vector.shape_cast %94 : vector<16xf32> to vector<16x1xf32>
    %96 = vector.broadcast %95 : vector<16x1xf32> to vector<16x16xf32>
    %97 = arith.subf %93, %96 : vector<16x16xf32>
    %98 = math.exp %97 : vector<16x16xf32>
    %cst_35 = arith.constant dense<0.000000e+00> : vector<16xf32>
    %99 = vector.multi_reduction <add>, %98, %cst_35 [1] : vector<16x16xf32> to vector<16xf32>
    %100 = vector.shape_cast %99 : vector<16xf32> to vector<16x1xf32>
    %101 = tpu.reciprocal %100 {approx = true} : vector<16x1xf32> -> vector<16x1xf32>
    %102 = vector.broadcast %101 : vector<16x1xf32> to vector<16x16xf32>
    %103 = arith.mulf %98, %102 : vector<16x16xf32>
    %cst_36 = arith.constant dense<0.000000e+00> : vector<16x8xf32>
    %104 = tpu.matmul %103, %88, %cst_36 {dimension_numbers = #tpu.dot_dimension_numbers<[1], [0], [0], [1], [0, 0, 1, 1], [], []>} : vector<16x16xf32>, vector<16x8xf32>, vector<16x8xf32> -> vector<16x8xf32>
    %105 = vector.extract_strided_slice %19 {offsets = [24, 0], sizes = [8, 32], strides = [1, 1]} : vector<32x32xf32> to vector<8x32xf32>
    %cst_37 = arith.constant dense<0.000000e+00> : vector<16x32xf32>
    %106 = tpu.matmul %104, %105, %cst_37 {dimension_numbers = #tpu.dot_dimension_numbers<[1], [0], [0], [1], [0, 0, 1, 1], [], []>} : vector<16x8xf32>, vector<8x32xf32>, vector<16x32xf32> -> vector<16x32xf32>
    %107 = arith.addf %85, %106 : vector<16x32xf32>
    %108 = vector.broadcast %20 : vector<1x32xf32> to vector<16x32xf32>
    %109 = arith.addf %107, %108 : vector<16x32xf32>
    %c96 = arith.constant 96 : index
    %c0_38 = arith.constant 0 : index
    %110 = vector.load %arg3[%c96, %c0_38] : memref<344x64xf32, #tpu.memory_space<vmem>>, vector<32x32xf32>
    %c339 = arith.constant 339 : index
    %c0_39 = arith.constant 0 : index
    %111 = vector.load %arg3[%c339, %c0_39] : memref<344x64xf32, #tpu.memory_space<vmem>>, vector<1x32xf32>
    %c128 = arith.constant 128 : index
    %c0_40 = arith.constant 0 : index
    %112 = vector.load %arg3[%c128, %c0_40] : memref<344x64xf32, #tpu.memory_space<vmem>>, vector<32x1xf32>
    %c340 = arith.constant 340 : index
    %c0_41 = arith.constant 0 : index
    %113 = vector.load %arg3[%c340, %c0_41] : memref<344x64xf32, #tpu.memory_space<vmem>>, vector<1x1xf32>
    %cst_42 = arith.constant dense<0.000000e+00> : vector<16x32xf32>
    %114 = tpu.matmul %109, %110, %cst_42 {dimension_numbers = #tpu.dot_dimension_numbers<[1], [0], [0], [1], [0, 0, 1, 1], [], []>} : vector<16x32xf32>, vector<32x32xf32>, vector<16x32xf32> -> vector<16x32xf32>
    %115 = vector.broadcast %111 : vector<1x32xf32> to vector<16x32xf32>
    %116 = arith.addf %114, %115 : vector<16x32xf32>
    %117 = math.tanh %116 : vector<16x32xf32>
    %cst_43 = arith.constant dense<0.000000e+00> : vector<16x1xf32>
    %118 = tpu.matmul %117, %112, %cst_43 {dimension_numbers = #tpu.dot_dimension_numbers<[1], [0], [0], [1], [0, 0, 1, 1], [], []>} : vector<16x32xf32>, vector<32x1xf32>, vector<16x1xf32> -> vector<16x1xf32>
    %119 = vector.broadcast %113 : vector<1x1xf32> to vector<16x1xf32>
    %120 = arith.addf %118, %119 : vector<16x1xf32>
    %121 = vector.extract_strided_slice %120 {offsets = [0, 0], sizes = [8, 1], strides = [1, 1]} : vector<16x1xf32> to vector<8x1xf32>
    %122 = vector.extract_strided_slice %109 {offsets = [0, 0], sizes = [8, 32], strides = [1, 1]} : vector<16x32xf32> to vector<8x32xf32>
    %cst_44 = arith.constant dense<0xFF800000> : vector<1xf32>
    %123 = vector.multi_reduction <maximumf>, %121, %cst_44 [0] : vector<8x1xf32> to vector<1xf32>
    %124 = vector.shape_cast %123 : vector<1xf32> to vector<1x1xf32>
    %125 = vector.broadcast %124 : vector<1x1xf32> to vector<8x1xf32>
    %126 = arith.subf %121, %125 : vector<8x1xf32>
    %127 = math.exp %126 : vector<8x1xf32>
    %cst_45 = arith.constant dense<0.000000e+00> : vector<1xf32>
    %128 = vector.multi_reduction <add>, %127, %cst_45 [0] : vector<8x1xf32> to vector<1xf32>
    %129 = vector.shape_cast %128 : vector<1xf32> to vector<1x1xf32>
    %130 = tpu.reciprocal %129 {approx = true} : vector<1x1xf32> -> vector<1x1xf32>
    %131 = vector.broadcast %130 : vector<1x1xf32> to vector<8x1xf32>
    %132 = arith.mulf %127, %131 : vector<8x1xf32>
    %133 = vector.broadcast %132 : vector<8x1xf32> to vector<8x32xf32>
    %134 = arith.mulf %133, %122 : vector<8x32xf32>
    %cst_46 = arith.constant dense<0.000000e+00> : vector<32xf32>
    %135 = vector.multi_reduction <add>, %134, %cst_46 [0] : vector<8x32xf32> to vector<32xf32>
    %136 = vector.shape_cast %135 : vector<32xf32> to vector<1x32xf32>
    %137 = vector.extract_strided_slice %120 {offsets = [8, 0], sizes = [8, 1], strides = [1, 1]} : vector<16x1xf32> to vector<8x1xf32>
    %138 = vector.extract_strided_slice %109 {offsets = [8, 0], sizes = [8, 32], strides = [1, 1]} : vector<16x32xf32> to vector<8x32xf32>
    %cst_47 = arith.constant dense<0xFF800000> : vector<1xf32>
    %139 = vector.multi_reduction <maximumf>, %137, %cst_47 [0] : vector<8x1xf32> to vector<1xf32>
    %140 = vector.shape_cast %139 : vector<1xf32> to vector<1x1xf32>
    %141 = vector.broadcast %140 : vector<1x1xf32> to vector<8x1xf32>
    %142 = arith.subf %137, %141 : vector<8x1xf32>
    %143 = math.exp %142 : vector<8x1xf32>
    %cst_48 = arith.constant dense<0.000000e+00> : vector<1xf32>
    %144 = vector.multi_reduction <add>, %143, %cst_48 [0] : vector<8x1xf32> to vector<1xf32>
    %145 = vector.shape_cast %144 : vector<1xf32> to vector<1x1xf32>
    %146 = tpu.reciprocal %145 {approx = true} : vector<1x1xf32> -> vector<1x1xf32>
    %147 = vector.broadcast %146 : vector<1x1xf32> to vector<8x1xf32>
    %148 = arith.mulf %143, %147 : vector<8x1xf32>
    %149 = vector.broadcast %148 : vector<8x1xf32> to vector<8x32xf32>
    %150 = arith.mulf %149, %138 : vector<8x32xf32>
    %cst_49 = arith.constant dense<0.000000e+00> : vector<32xf32>
    %151 = vector.multi_reduction <add>, %150, %cst_49 [0] : vector<8x32xf32> to vector<32xf32>
    %152 = vector.shape_cast %151 : vector<32xf32> to vector<1x32xf32>
    %153 = tpu.concatenate %136, %152 in 0 : vector<1x32xf32>, vector<1x32xf32> -> vector<2x32xf32>
    %c0_50 = arith.constant 0 : index
    %c0_51 = arith.constant 0 : index
    %154 = vector.load %arg2[%c0_50, %c0_51] : memref<2x32xf32, #tpu.memory_space<vmem>>, vector<2x32xf32>
    %c160 = arith.constant 160 : index
    %c0_52 = arith.constant 0 : index
    %155 = vector.load %arg3[%c160, %c0_52] : memref<344x64xf32, #tpu.memory_space<vmem>>, vector<32x32xf32>
    %c192 = arith.constant 192 : index
    %c0_53 = arith.constant 0 : index
    %156 = vector.load %arg3[%c192, %c0_53] : memref<344x64xf32, #tpu.memory_space<vmem>>, vector<32x32xf32>
    %c341 = arith.constant 341 : index
    %c0_54 = arith.constant 0 : index
    %157 = vector.load %arg3[%c341, %c0_54] : memref<344x64xf32, #tpu.memory_space<vmem>>, vector<1x32xf32>
    %c224 = arith.constant 224 : index
    %c0_55 = arith.constant 0 : index
    %158 = vector.load %arg3[%c224, %c0_55] : memref<344x64xf32, #tpu.memory_space<vmem>>, vector<32x1xf32>
    %c342 = arith.constant 342 : index
    %c0_56 = arith.constant 0 : index
    %159 = vector.load %arg3[%c342, %c0_56] : memref<344x64xf32, #tpu.memory_space<vmem>>, vector<1x1xf32>
    %cst_57 = arith.constant dense<0.000000e+00> : vector<2x32xf32>
    %160 = tpu.matmul %153, %155, %cst_57 {dimension_numbers = #tpu.dot_dimension_numbers<[1], [0], [0], [1], [0, 0, 1, 1], [], []>} : vector<2x32xf32>, vector<32x32xf32>, vector<2x32xf32> -> vector<2x32xf32>
    %cst_58 = arith.constant dense<0.000000e+00> : vector<2x32xf32>
    %161 = tpu.matmul %154, %156, %cst_58 {dimension_numbers = #tpu.dot_dimension_numbers<[1], [0], [0], [1], [0, 0, 1, 1], [], []>} : vector<2x32xf32>, vector<32x32xf32>, vector<2x32xf32> -> vector<2x32xf32>
    %162 = arith.addf %160, %161 : vector<2x32xf32>
    %163 = vector.broadcast %157 : vector<1x32xf32> to vector<2x32xf32>
    %164 = arith.addf %162, %163 : vector<2x32xf32>
    %cst_59 = arith.constant 0.000000e+00 : f32
    %165 = vector.broadcast %cst_59 : f32 to vector<2x32xf32>
    %166 = arith.maximumf %164, %165 : vector<2x32xf32>
    %cst_60 = arith.constant dense<0.000000e+00> : vector<2x1xf32>
    %167 = tpu.matmul %166, %158, %cst_60 {dimension_numbers = #tpu.dot_dimension_numbers<[1], [0], [0], [1], [0, 0, 1, 1], [], []>} : vector<2x32xf32>, vector<32x1xf32>, vector<2x1xf32> -> vector<2x1xf32>
    %168 = vector.broadcast %159 : vector<1x1xf32> to vector<2x1xf32>
    %169 = arith.addf %167, %168 : vector<2x1xf32>
    %c0_61 = arith.constant 0 : index
    %c0_62 = arith.constant 0 : index
    %170 = vector.load %arg4[%c0_61, %c0_62] : memref<2x1xf32, #tpu.memory_space<vmem>>, vector<2x1xf32>
    tpu.vector_store %arg4[%c0_61, %c0_62], %169 {strides = array<i32>} : memref<2x1xf32, #tpu.memory_space<vmem>>, vector<2x1xf32>,
    return
  }
  func.func @transform_0(%arg0: i32) -> (i32, i32) {
    %c0_i32 = arith.constant 0 : i32
    %c0_i32_0 = arith.constant 0 : i32
    %c0_i32_1 = arith.constant 0 : i32
    return %c0_i32, %c0_i32_0 : i32, i32
  }
  func.func @transform_1(%arg0: i32) -> (i32, i32) {
    %c0_i32 = arith.constant 0 : i32
    %c0_i32_0 = arith.constant 0 : i32
    %c0_i32_1 = arith.constant 0 : i32
    return %c0_i32, %c0_i32_0 : i32, i32
  }
  func.func @transform_2(%arg0: i32) -> (i32, i32) {
    %c0_i32 = arith.constant 0 : i32
    %c0_i32_0 = arith.constant 0 : i32
    %c0_i32_1 = arith.constant 0 : i32
    return %c0_i32, %c0_i32_0 : i32, i32
  }
  func.func @transform_3(%arg0: i32) -> (i32, i32) {
    %c0_i32 = arith.constant 0 : i32
    %c0_i32_0 = arith.constant 0 : i32
    %c0_i32_1 = arith.constant 0 : i32
    return %c0_i32, %c0_i32_0 : i32, i32
  }
}

</mosaic_0001>

<bundles_post_ra>
// kernel: tpu_custom_call.1
= control target key start
LH: loop header
LB: loop body
LE: loop exit
PB: predicated region body
PF: predicated region fallthrough
CT: control target
= control target key end

     0   :  { %vm24_vm0 = vcmask 261120   ;;  %s1005_s14 = smov 96   ;;  %s1006_s15 = smov 88   ;;  %vm137_vm1 = vcmask 64512   ;;  %vm173_vm2 = vcmask 130048   ;;  %vm722_vm3 = vcmask 7168   ;;  %s1333_s2 = inlined_call_operand.vmem [shape: f32[344,64], index: 2, kind: input, shape index: {}]   ;;  %s1334_s0 = inlined_call_operand.vmem [shape: f32[16,32], index: 0, kind: input, shape index: {}]   ;;  %s1335_s1 = inlined_call_operand.vmem [shape: f32[2,32], index: 1, kind: input, shape index: {}]   ;;  %s1336_s3 = inlined_call_operand.vmem [shape: f32[2,1], index: 3, kind: output, shape index: {}]  }
   0x1   :  { %v23_v0 = vld [vmem:[%s1333_s2 + $0x118] sm:$0xff]  ;;  %v22_v1 = vld [vmem:[%s1333_s2 + $0x110] sm:$0xff]  ;;  %v21_v2 = vld [vmem:[%s1333_s2 + $0x108] sm:$0xff]  ;;  %s1007_s16 = smov 120   ;;  %s1008_s17 = smov 80   ;;  %vm787_vm4 = vcmask 1040384  }
   0x2   :  { %43 = vmatpush.msra.mxu0 %v23_v0  ;;  %v63_v3 = vld [vmem:[%s1333_s2 + $0x18] sm:$0xff]  ;;  %v20_v4 = vld [vmem:[%s1333_s2 + $0x100] sm:$0xff]  ;;  %v1058_v6 = vld [vmem:[%s1334_s0 + $0x8] sm:$0xff]  ;;  %s1009_s18 = smov 72   ;;  %s1010_s19 = smov 104   ;;  %vm877_vm5 = vcmask 1024  }
   0x3   :  { %84 = vmatpush.msra.mxu1 %v63_v3  ;;  %v1051_v5 = vld [vmem:[%s1334_s0] sm:$0xff]  ;;  %v62_v7 = vld [vmem:[%s1333_s2 + $0x10] sm:$0xff]  ;;  %v61_v8 = vld [vmem:[%s1333_s2 + $0x8] sm:$0xff]  ;;  %s1011_s6 = smov 112  }
   0x4   :  { %44 = vmatpush.msra.mxu0 %v22_v1  ;;  %v60_v9 = vld [vmem:[%s1333_s2] sm:$0xff]  ;;  %v18_v11 = vld [vmem:[%s1333_s2 + $0x130] sm:$0xff]  ;;  %v17_v16 = vld [vmem:[%s1333_s2 + $0x128] sm:$0xff] }
   0x5   :  { %85 = vmatpush.msra.mxu1 %v62_v7  ;;  %v16_v10 = vld [vmem:[%s1333_s2 + $0x120] sm:$0xff]  ;;  %v19_v17 = vld [vmem:[%s1333_s2 + $0x138] sm:$0xff]  ;;  %v55_v18 = vmul.f32 %v17_v16, %v1058_v6  ;;  %v954_v23 = vld [vmem:[%s1333_s2 + $0x150] ss:$0 sm:$0xff] }
   0x6   :  { %45 = vmatpush.msra.mxu0 %v21_v2  ;;  %v54_v12 = vmul.f32 %v16_v10, %v1051_v5  ;;  %v1116_v31 = vld [vmem:[%s1333_s2 + $0x140] sm:$0xff]  ;;  %v1123_v36 = vld [vmem:[%s1333_s2 + $0x148] sm:$0xff]  ;;  %v98_v40 = vld [vmem:[%s1333_s2 + $0x38] sm:$0xff] }
   0x7   :  { %86 = vmatpush.msra.mxu1 %v61_v8  ;;  %v97_v41 = vld [vmem:[%s1333_s2 + $0x30] sm:$0xff]  ;;  %113 = vmatpush.msra.mxu2 %v98_v40  ;;  %v96_v42 = vld [vmem:[%s1333_s2 + $0x28] sm:$0xff]  ;;  %v95_v43 = vld [vmem:[%s1333_s2 + $0x20] sm:$0xff] }
   0x8   :  { %46 = vmatpush.msra.mxu0 %v20_v4  ;;  %v955_v59 = vld [vmem:[%s1333_s2 + $0x151] ss:$0 sm:$0xff]  ;;  %v126_v0 = vld [vmem:[%s1333_s2 + $0x40] sm:$0xff] }
   0x9   :  { %883 = vmatmul.msk.f32.vlgmr.msra.gmra.mxu0 %vm24_vm0, %v1051_v5  ;;  %87 = vmatpush.msra.mxu1 %v60_v9 }
   0xa   :  { %114 = vmatpush.msra.mxu2 %v97_v41 }
   0xc   :  { %115 = vmatpush.msra.mxu2 %v96_v42 }
   0xe   :  { %116 = vmatpush.msra.mxu2 %v95_v43 }
   0xf   :  { %887 = vmatmul.msk.f32.vlgmr.msra.gmra.mxu2 %vm24_vm0, %v1051_v5 }
  0x11   :  { %884 = vmatmul.msk.f32.gmra.mxu0 %vm24_vm0, %v1058_v6 }
  0x17   :  { %888 = vmatmul.msk.f32.gmra.mxu2 %vm24_vm0, %v1058_v6 }
  0x86   :  { %v48_v13 = vpop.f32.mrf.mxu0 }
  0x87   :  { %v56_v14 = vmul.f32 %v48_v13, %v18_v11 }
  0x89   :  { %v58_v15 = vadd.f32 %v56_v14, %v54_v12 }
  0x8b   :  { %885 = vmatmul.msk.f32.vlgmr.msra.gmra.mxu1 %vm24_vm0, %v58_v15 }
  0x8e   :  { %v51_v19 = vpop.f32.mrf.mxu0 }
  0x8f   :  { %v57_v20 = vmul.f32 %v51_v19, %v19_v17 }
  0x91   :  { %v59_v21 = vadd.f32 %v57_v20, %v55_v18 }
  0x92   :  { %v118_v58 = vpop.f32.mrf.mxu2 }
  0x93   :  { %886 = vmatmul.msk.f32.gmra.mxu1 %vm24_vm0, %v59_v21  ;;  %v119_v61 = vadd.f32 %v955_v59, %v118_v58 }
  0x9a   :  { %v121_v60 = vpop.f32.mrf.mxu2 }
  0x9b   :  { %v122_v62 = vadd.f32 %v955_v59, %v121_v60 }
  0x9d   :  { %216 = vmatpush.msrb.mxu0 %v122_v62  ;;  %v1163_v63 = vpack.i.bf16 %v119_v61, %v122_v62 }
  0x9f   :  { %217 = vmatpush.msrb.mxu0 %v119_v61 }
  0xa1   :  { %377 = vmatpush.msra.mxu0 %v126_v0 }
 0x108   :  { %v89_v22 = vpop.f32.mrf.mxu1 }
 0x109   :  { %v1093_v26 = vadd.f32 %v954_v23, %v89_v22 }
 0x110   :  { %v92_v24 = vpop.f32.mrf.mxu1 }
 0x111   :  { %v1090_v25 = vadd.f32 %v954_v23, %v92_v24 }
 0x113   :  { %135 = vrot.lane.b32.xlu0 %v1090_v25, %s1005_s14 }
 0x11b   :  { %133 = vrot.lane.b32.xlu0 %v1093_v26, %s1005_s14 }
 0x123   :  { %231 = vrot.lane.b32.xlu0 %v1090_v25, %s1006_s15 }
 0x12b   :  { %227 = vrot.lane.b32.xlu0 %v1090_v25, %s1007_s16 }
 0x133   :  { %391 = vrot.lane.b32.xlu0 %v1090_v25, %s1008_s17 }
 0x13b   :  { %389 = vrot.lane.b32.xlu0 %v1093_v26, %s1008_s17 }
 0x143   :  { %520 = vrot.lane.b32.xlu0 %v1093_v26, %s1009_s18 }
 0x14b   :  { %518 = vrot.lane.b32.xlu0 %v1090_v25, %s1010_s19 }
 0x185   :  { %v136_v27 = vpop.permute.xlu0 %135 }
 0x186   :  { %889 = vmatpush.xpose.msk.msra.mxu3 %vm137_vm1, %v136_v27 }
 0x18d   :  { %v134_v28 = vpop.permute.xlu0 %133 }
 0x18e   :  { %890 = vmatpush.xpose.msk.msra.mxu3 %vm137_vm1, %v134_v28 }
 0x191   :  { %891 = vmatmul.msk.f32.vlgmr.msra.gmra.mxu3 %vm137_vm1, %v1093_v26 }
 0x195   :  { %v232_v29 = vpop.permute.xlu0 %231 }
 0x196   :  { %895 = vmatpush.xpose.msk.msrb.mxu1 %vm137_vm1, %v232_v29 }
 0x199   :  { %892 = vmatmul.msk.f32.gmra.mxu3 %vm137_vm1, %v1090_v25 }
 0x19d   :  { %v228_v52 = vpop.permute.xlu0 %227 }
 0x1a5   :  { %v392_v55 = vpop.permute.xlu0 %391 }
 0x1ad   :  { %v390_v57 = vpop.permute.xlu0 %389 }
 0x1b5   :  { %v521_v6 = vpop.permute.xlu0 %520 }
 0x1bd   :  { %v519_v24 = vpop.permute.xlu0 %518 }
 0x214   :  { %v163_v30 = vpop.f32.mrf.mxu3 }
 0x215   :  { %v169_v32 = vmul.f32 0.35355338, %v163_v30 }
 0x217   :  { %v171_v33 = vadd.f32 %v169_v32, %v1116_v31 }
 0x219   :  { %v174_v34 = vsel %vm173_vm2, %v171_v33, -inf }
 0x21a   :  { %175 = vmax.xlane.f32.xlu1 %v174_v34 }
 0x21c   :  { %v166_v35 = vpop.f32.mrf.mxu3 }
 0x21d   :  { %v170_v37 = vmul.f32 0.35355338, %v166_v35 }
 0x21f   :  { %v172_v38 = vadd.f32 %v170_v37, %v1123_v36 }
 0x221   :  { %v177_v39 = vsel %vm173_vm2, %v172_v38, -inf }
 0x222   :  { %178 = vmax.xlane.f32.xlu1 %v177_v39 }
 0x23b   :  { %229 = vrot.lane.b32.xlu1 %v1093_v26, %s1006_s15 }
 0x243   :  { %522 = vrot.lane.b32.xlu1 %v1090_v25, %s1009_s18 }
 0x24b   :  { %516 = vrot.lane.b32.xlu1 %v1093_v26, %s1010_s19 }
 0x28d   :  { %v176_v44 = vpop.xlane.xlu1 %175 }
 0x28e   :  { %v180_v45 = vsub.f32 %v171_v33, %v176_v44 }
 0x290   :  { %v182_v46 = vmul.f32 1.442695, %v180_v45 }
 0x292   :  { %961 = vpow2.f32 %v182_v46 }
 0x295   :  { %v179_v47 = vpop.xlane.xlu1 %178 }
 0x296   :  { %v181_v48 = vsub.f32 %v172_v38, %v179_v47 }
 0x298   :  { %v962_v49 = vpop.eup %961  ;;  %v184_v50 = vmul.f32 1.442695, %v181_v48 }
 0x299   :  { %v186_v51 = vsel %vm173_vm2, %v962_v49, 0.0 }
 0x29a   :  { %963 = vpow2.f32 %v184_v50  ;;  %187 = vadd.xlane.f32.xlu2 %v186_v51 }
 0x2a0   :  { %v964_v53 = vpop.eup %963 }
 0x2a1   :  { %v189_v54 = vsel %vm173_vm2, %v964_v53, 0.0 }
 0x2a2   :  { %190 = vadd.xlane.f32.xlu2 %v189_v54 }
 0x2ad   :  { %v230_v56 = vpop.permute.xlu1 %229 }
 0x2ae   :  { %896 = vmatpush.xpose.msk.msrb.mxu1 %vm137_vm1, %v230_v56 }
 0x2b2   :  { %905 = vmatpush.xpose.msk.msra.mxu1 %vm137_vm1, %v392_v55 }
 0x2b5   :  { %v523_v5 = vpop.permute.xlu1 %522 }
 0x2b6   :  { %906 = vmatpush.xpose.msk.msra.mxu1 %vm137_vm1, %v390_v57 }
 0x2ba   :  { %225 = vrot.lane.b32.xlu2 %v1093_v26, %s1007_s16 }
 0x2bd   :  { %v517_v19 = vpop.permute.xlu1 %516 }
 0x2c2   :  { %385 = vrot.lane.b32.xlu2 %v1093_v26, %s1011_s6 }
 0x2ca   :  { %387 = vrot.lane.b32.xlu2 %v1090_v25, %s1011_s6 }
 0x30d   :  { %v188_v1 = vpop.xlane.xlu2 %187 }
 0x30e   :  { %965 = vrcp.f32 %v188_v1 }
 0x314   :  { %v966_v2 = vpop.eup %965 }
 0x315   :  { %v191_v3 = vpop.xlane.xlu2 %190  ;;  %v194_v4 = vmul.f32 %v966_v2, %v962_v49 }
 0x316   :  { %967 = vrcp.f32 %v191_v3 }
 0x317   :  { %893 = vmatmul.msk.f32.vlgmr.msrb.gmra.mxu0 %vm173_vm2, %v194_v4 }
 0x318   :  { %913 = vmatpush.xpose.msk.msrb.mxu0 %vm137_vm1, %v523_v5 }
 0x31c   :  { %v968_v7 = vpop.eup %967  ;;  %914 = vmatpush.xpose.msk.msrb.mxu0 %vm137_vm1, %v521_v6 }
 0x31d   :  { %v226_v8 = vpop.permute.xlu2 %225  ;;  %v195_v9 = vmul.f32 %v968_v7, %v964_v53 }
 0x31e   :  { %897 = vmatmul.msk.f32.vlgmr.msrb.gmra.mxu1 %vm137_vm1, %v226_v8 }
 0x31f   :  { %894 = vmatmul.msk.f32.gmra.mxu0 %vm173_vm2, %v195_v9 }
 0x325   :  { %v386_v10 = vpop.permute.xlu2 %385 }
 0x326   :  { %898 = vmatmul.msk.f32.gmra.mxu1 %vm137_vm1, %v228_v52 }
 0x32d   :  { %v388_v11 = vpop.permute.xlu2 %387 }
 0x32e   :  { %907 = vmatmul.msk.f32.vlgmr.msra.gmra.mxu1 %vm137_vm1, %v386_v10 }
 0x336   :  { %908 = vmatmul.msk.f32.gmra.mxu1 %vm137_vm1, %v388_v11 }
 0x394   :  { %v219_v12 = vpop.f32.mrf.mxu0 }
 0x395   :  { %903 = vmatmul.msk.f32.vlgmr.msra.gmra.mxu0 %vm137_vm1, %v219_v12 }
 0x39b   :  { %v258_v13 = vpop.f32.mrf.mxu1 }
 0x39c   :  { %v264_v14 = vmul.f32 0.35355338, %v258_v13  ;;  %v222_v15 = vpop.f32.mrf.mxu0 }
 0x39d   :  { %904 = vmatmul.msk.f32.gmra.mxu0 %vm137_vm1, %v222_v15 }
 0x39e   :  { %v266_v16 = vadd.f32 %v264_v14, %v1116_v31 }
 0x3a0   :  { %v268_v17 = vsel %vm173_vm2, %v266_v16, -inf }
 0x3a1   :  { %269 = vmax.xlane.f32.xlu2 %v268_v17 }
 0x3a3   :  { %v261_v18 = vpop.f32.mrf.mxu1 }
 0x3a4   :  { %v265_v20 = vmul.f32 0.35355338, %v261_v18 }
 0x3a5   :  { %915 = vmatmul.msk.f32.vlgmr.msrb.gmra.mxu0 %vm137_vm1, %v517_v19 }
 0x3a6   :  { %v267_v21 = vadd.f32 %v265_v20, %v1123_v36 }
 0x3a8   :  { %v271_v22 = vsel %vm173_vm2, %v267_v21, -inf }
 0x3a9   :  { %272 = vmax.xlane.f32.xlu1 %v271_v22 }
 0x3ab   :  { %v418_v23 = vpop.f32.mrf.mxu1 }
 0x3ac   :  { %v424_v25 = vmul.f32 0.35355338, %v418_v23 }
 0x3ad   :  { %916 = vmatmul.msk.f32.gmra.mxu0 %vm137_vm1, %v519_v24 }
 0x3ae   :  { %v426_v26 = vadd.f32 %v424_v25, %v1116_v31 }
 0x3b0   :  { %v428_v27 = vsel %vm173_vm2, %v426_v26, -inf }
 0x3b1   :  { %429 = vmax.xlane.f32.xlu0 %v428_v27 }
 0x3b3   :  { %v421_v28 = vpop.f32.mrf.mxu1 }
 0x3b4   :  { %v425_v29 = vmul.f32 0.35355338, %v421_v28 }
 0x3b6   :  { %v427_v30 = vadd.f32 %v425_v29, %v1123_v36 }
 0x3b8   :  { %v431_v32 = vsel %vm173_vm2, %v427_v30, -inf }
 0x3b9   :  { %432 = vmax.xlane.f32.xlu2 %v431_v32 }
 0x412   :  { %v1188_v33 = vpop.f32.mrf.mxu0 }
 0x414   :  { %v270_v34 = vpop.xlane.xlu2 %269 }
 0x415   :  { %v274_v35 = vsub.f32 %v266_v16, %v270_v34 }
 0x417   :  { %v276_v37 = vmul.f32 1.442695, %v274_v35 }
 0x419   :  { %969 = vpow2.f32 %v276_v37 }
 0x41a   :  { %v1190_v38 = vpop.f32.mrf.mxu0 }
 0x41c   :  { %v273_v42 = vpop.xlane.xlu1 %272 }
 0x41d   :  { %v275_v47 = vsub.f32 %v267_v21, %v273_v42 }
 0x41f   :  { %v970_v39 = vpop.eup %969  ;;  %v278_v50 = vmul.f32 1.442695, %v275_v47 }
 0x420   :  { %v280_v40 = vsel %vm173_vm2, %v970_v39, 0.0 }
 0x421   :  { %281 = vadd.xlane.f32.xlu0 %v280_v40  ;;  %v128_v40 = vld [vmem:[%s1333_s2 + $0x50] sm:$0xff] }
 0x422   :  { %v549_v41 = vpop.f32.mrf.mxu0 }
 0x423   :  { %v555_v43 = vmul.f32 0.35355338, %v549_v41  ;;  %v129_v41 = vld [vmem:[%s1333_s2 + $0x58] sm:$0xff] }
 0x424   :  { %v430_v44 = vpop.xlane.xlu0 %429 }
 0x425   :  { %v434_v45 = vsub.f32 %v426_v26, %v430_v44  ;;  %v557_v46 = vadd.f32 %v555_v43, %v1116_v31 }
 0x427   :  { %v436_v48 = vmul.f32 1.442695, %v434_v45  ;;  %v559_v49 = vsel %vm173_vm2, %v557_v46, -inf }
 0x428   :  { %560 = vmax.xlane.f32.xlu1 %v559_v49  ;;  %v652_v49 = vld [vmem:[%s1333_s2 + $0x70] sm:$0xff] }
 0x429   :  { %971 = vpow2.f32 %v436_v48  ;;  %v653_v48 = vld [vmem:[%s1333_s2 + $0x78] sm:$0xff] }
 0x42a   :  { %v552_v51 = vpop.f32.mrf.mxu0  ;;  %973 = vpow2.f32 %v278_v50  ;;  %v651_v50 = vld [vmem:[%s1333_s2 + $0x68] sm:$0xff] }
 0x42b   :  { %v556_v52 = vmul.f32 0.35355338, %v552_v51  ;;  %v650_v51 = vld [vmem:[%s1333_s2 + $0x60] sm:$0xff] }
 0x42c   :  { %v433_v53 = vpop.xlane.xlu2 %432 }
 0x42d   :  { %v435_v54 = vsub.f32 %v427_v30, %v433_v53  ;;  %v558_v55 = vadd.f32 %v556_v52, %v1123_v36  ;;  %v127_v30 = vld [vmem:[%s1333_s2 + $0x48] sm:$0xff]  ;;  %v658_v53 = vld [vmem:[%s1333_s2 + $0x98] sm:$0xff] }
 0x42e   :  { %348 = vmatpush.msrb.mxu3 %v127_v30  ;;  %711 = vmatpush.msra.mxu0 %v658_v53 }
 0x42f   :  { %v972_v56 = vpop.eup %971  ;;  %v438_v57 = vmul.f32 1.442695, %v435_v54  ;;  %v562_v58 = vsel %vm173_vm2, %v558_v55, -inf  ;;  %v657_v54 = vld [vmem:[%s1333_s2 + $0x90] sm:$0xff] }
 0x430   :  { %563 = vmax.xlane.f32.xlu2 %v562_v58  ;;  %v440_v31 = vsel %vm173_vm2, %v972_v56, 0.0  ;;  %v974_v59 = vpop.eup %973  ;;  %506 = vmatpush.msra.mxu3 %v128_v40 }
 0x431   :  { %975 = vpow2.f32 %v438_v57  ;;  %441 = vadd.xlane.f32.xlu0 %v440_v31  ;;  %v283_v61 = vsel %vm173_vm2, %v974_v59, 0.0  ;;  %712 = vmatpush.msra.mxu0 %v657_v54  ;;  %v956_v31 = vld [vmem:[%s1333_s2 + $0x152] ss:$0 sm:$0xff] }
 0x437   :  { %v976_v60 = vpop.eup %975 }
 0x438   :  { %284 = vadd.xlane.f32.xlu2 %v283_v61  ;;  %v443_v62 = vsel %vm173_vm2, %v976_v60, 0.0 }
 0x439   :  { %444 = vadd.xlane.f32.xlu0 %v443_v62 }
 0x441   :  { %937 = vrot.lane.b32.xlu1 %v1163_v63, %s1007_s16 }
 0x449   :  { %947 = vrot.lane.b32.xlu1 %v1163_v63, %s1010_s19 }
 0x450   :  { %942 = vrot.lane.b32.xlu2 %v1163_v63, %s1011_s6 }
 0x494   :  { %v282_v7 = vpop.xlane.xlu0 %281 }
 0x49b   :  { %v561_v36 = vpop.xlane.xlu1 %560 }
 0x49c   :  { %v565_v0 = vsub.f32 %v557_v46, %v561_v36 }
 0x49e   :  { %v567_v1 = vmul.f32 1.442695, %v565_v0 }
 0x4a0   :  { %977 = vpow2.f32 %v567_v1 }
 0x4a3   :  { %v564_v2 = vpop.xlane.xlu2 %563 }
 0x4a4   :  { %v566_v3 = vsub.f32 %v558_v55, %v564_v2  ;;  %v442_v17 = vpop.xlane.xlu0 %441 }
 0x4a6   :  { %v978_v4 = vpop.eup %977  ;;  %v569_v5 = vmul.f32 1.442695, %v566_v3 }
 0x4a7   :  { %v571_v6 = vsel %vm173_vm2, %v978_v4, 0.0 }
 0x4a8   :  { %979 = vpow2.f32 %v569_v5  ;;  %572 = vadd.xlane.f32.xlu0 %v571_v6 }
 0x4a9   :  { %981 = vrcp.f32 %v282_v7 }
 0x4ab   :  { %v285_v8 = vpop.xlane.xlu2 %284 }
 0x4ac   :  { %983 = vrcp.f32 %v285_v8  ;;  %v445_v24 = vpop.xlane.xlu0 %444 }
 0x4ad   :  { %985 = vrcp.f32 %v442_v17 }
 0x4ae   :  { %v980_v9 = vpop.eup %979  ;;  %987 = vrcp.f32 %v445_v24 }
 0x4af   :  { %v574_v10 = vsel %vm173_vm2, %v980_v9, 0.0  ;;  %v982_v11 = vpop.eup %981 }
 0x4b0   :  { %575 = vadd.xlane.f32.xlu0 %v574_v10  ;;  %v288_v15 = vmul.f32 %v982_v11, %v970_v39 }
 0x4b2   :  { %v984_v20 = vpop.eup %983 }
 0x4b3   :  { %v938_v63 = vpop.permute.xlu1 %937  ;;  %v943_v13 = vpop.permute.xlu2 %942  ;;  %v289_v23 = vmul.f32 %v984_v20, %v974_v59 }
 0x4b4   :  { %v939_v12 = vunpack.i.l.bf16 %v938_v63  ;;  %v940_v14 = vunpack.i.h.bf16 %v938_v63  ;;  %v944_v16 = vunpack.i.l.bf16 %v943_v13  ;;  %v945_v18 = vunpack.i.h.bf16 %v943_v13  ;;  %v986_v25 = vpop.eup %985  ;;  %v958_v63 = vld [vmem:[%s1333_s2 + $0x154] ss:$0 sm:$0xff] }
 0x4b5   :  { %v448_v26 = vmul.f32 %v986_v25, %v972_v56  ;;  %v988_v27 = vpop.eup %987 }
 0x4b6   :  { %318 = vmatpush.msrb.mxu2 %v939_v12  ;;  %v449_v28 = vmul.f32 %v988_v27, %v976_v60 }
 0x4b8   :  { %319 = vmatpush.msrb.mxu2 %v940_v14 }
 0x4b9   :  { %899 = vmatmul.msk.f32.vlgmr.msrb.gmra.mxu2 %vm173_vm2, %v288_v15 }
 0x4ba   :  { %476 = vmatpush.msra.mxu2 %v944_v16 }
 0x4bb   :  { %v948_v19 = vpop.permute.xlu1 %947 }
 0x4bc   :  { %v949_v21 = vunpack.i.l.bf16 %v948_v19  ;;  %477 = vmatpush.msra.mxu2 %v945_v18  ;;  %v950_v22 = vunpack.i.h.bf16 %v948_v19  ;;  %v1012_v19 = vmov 0  }
 0x4bd   :  { %951 = vset.pattern.permute.xlu1 %v1012_v19  ;;  %952 = vset.pattern.permute.xlu2 %v1012_v19 }
 0x4be   :  { %607 = vmatpush.msrb.mxu1 %v949_v21  ;;  %637 = vmatpush.msrb.mxu2 %v129_v41 }
 0x4bf   :  { %953 = vset.pattern.permute.xlu0 %v1012_v19 }
 0x4c0   :  { %608 = vmatpush.msrb.mxu1 %v950_v22 }
 0x4c1   :  { %900 = vmatmul.msk.f32.gmra.mxu2 %vm173_vm2, %v289_v23 }
 0x4c9   :  { %909 = vmatmul.msk.f32.vlgmr.msra.gmra.mxu2 %vm173_vm2, %v448_v26 }
 0x4d1   :  { %910 = vmatmul.msk.f32.gmra.mxu2 %vm173_vm2, %v449_v28 }
 0x51b   :  { %v573_v29 = vpop.xlane.xlu0 %572 }
 0x51c   :  { %989 = vrcp.f32 %v573_v29 }
 0x522   :  { %v990_v32 = vpop.eup %989 }
 0x523   :  { %v579_v34 = vmul.f32 %v990_v32, %v978_v4  ;;  %v576_v35 = vpop.xlane.xlu0 %575  ;;  %v655_v4 = vld [vmem:[%s1333_s2 + $0x80] sm:$0xff] }
 0x524   :  { %991 = vrcp.f32 %v576_v35 }
 0x525   :  { %917 = vmatmul.msk.f32.vlgmr.msrb.gmra.mxu1 %vm173_vm2, %v579_v34 }
 0x52a   :  { %v992_v37 = vpop.eup %991 }
 0x52b   :  { %v580_v39 = vmul.f32 %v992_v37, %v980_v9 }
 0x52d   :  { %918 = vmatmul.msk.f32.gmra.mxu1 %vm173_vm2, %v580_v39 }
 0x53c   :  { %v321_v42 = vpop.f32.mrf.mxu2 }
 0x53d   :  { %901 = vmatmul.msk.f32.vlgmr.msrb.gmra.mxu3 %vm137_vm1, %v321_v42 }
 0x53e   :  { %679 = vmatpush.msrb.mxu3 %v653_v48 }
 0x540   :  { %680 = vmatpush.msrb.mxu3 %v652_v49 }
 0x542   :  { %681 = vmatpush.msrb.mxu3 %v651_v50 }
 0x544   :  { %v324_v43 = vpop.f32.mrf.mxu2  ;;  %682 = vmatpush.msrb.mxu3 %v650_v51 }
 0x545   :  { %902 = vmatmul.msk.f32.gmra.mxu3 %vm137_vm1, %v324_v43 }
 0x54c   :  { %v479_v44 = vpop.f32.mrf.mxu2 }
 0x54d   :  { %911 = vmatmul.msk.f32.vlgmr.msra.gmra.mxu3 %vm137_vm1, %v479_v44 }
 0x554   :  { %v482_v45 = vpop.f32.mrf.mxu2 }
 0x555   :  { %912 = vmatmul.msk.f32.gmra.mxu3 %vm137_vm1, %v482_v45 }
 0x5a2   :  { %v610_v46 = vpop.f32.mrf.mxu1 }
 0x5a3   :  { %919 = vmatmul.msk.f32.vlgmr.msrb.gmra.mxu2 %vm137_vm1, %v610_v46 }
 0x5aa   :  { %v613_v47 = vpop.f32.mrf.mxu1 }
 0x5ab   :  { %920 = vmatmul.msk.f32.gmra.mxu2 %vm137_vm1, %v613_v47 }
 0x5c0   :  { %v350_v52 = vpop.f32.mrf.mxu3 }
 0x5c1   :  { %v380_v57 = vadd.f32 %v1188_v33, %v350_v52  ;;  %v656_v33 = vld [vmem:[%s1333_s2 + $0x88] sm:$0xff] }
 0x5c2   :  { %713 = vmatpush.msra.mxu0 %v656_v33  ;;  %v794_v33 = vld [vmem:[%s1333_s2 + $0xc0] sm:$0xff] }
 0x5c4   :  { %714 = vmatpush.msra.mxu0 %v655_v4  ;;  %v801_v4 = vld [vmem:[%s1333_s2 + $0xf0] sm:$0xff] }
 0x5c8   :  { %v353_v55 = vpop.f32.mrf.mxu3 }
 0x5c9   :  { %v383_v36 = vadd.f32 %v1190_v38, %v353_v55  ;;  %v957_v38 = vld [vmem:[%s1333_s2 + $0x153] ss:$0 sm:$0xff] }
 0x5d0   :  { %v508_v56 = vpop.f32.mrf.mxu3 }
 0x5d1   :  { %v514_v58 = vadd.f32 %v508_v56, %v380_v57 }
 0x5d8   :  { %v511_v62 = vpop.f32.mrf.mxu3 }
 0x5d9   :  { %v515_v0 = vadd.f32 %v511_v62, %v383_v36  ;;  %v796_v62 = vld [vmem:[%s1333_s2 + $0xd0] sm:$0xff]  ;;  %v790_v36 = vld [vmem:[%s1333_s2 + $0xa0] sm:$0xff] }
 0x626   :  { %v639_v59 = vpop.f32.mrf.mxu2 }
 0x627   :  { %v645_v60 = vadd.f32 %v639_v59, %v514_v58  ;;  %v793_v58 = vld [vmem:[%s1333_s2 + $0xb8] sm:$0xff] }
 0x628   :  { %842 = vmatpush.msra.mxu2 %v793_v58  ;;  %v797_v59 = vld [vmem:[%s1333_s2 + $0xd8] sm:$0xff] }
 0x629   :  { %v1251_v61 = vadd.f32 %v956_v31, %v645_v60  ;;  %v791_v60 = vld [vmem:[%s1333_s2 + $0xa8] sm:$0xff]  ;;  %819 = vmatpush.msra.mxu1 %v797_v59 }
 0x62b   :  { %921 = vmatmul.msk.f32.vlgmr.msrb.gmra.mxu3 %vm24_vm0, %v1251_v61  ;;  %820 = vmatpush.msra.mxu1 %v796_v62 }
 0x62e   :  { %v642_v1 = vpop.f32.mrf.mxu2 }
 0x62f   :  { %v646_v2 = vadd.f32 %v642_v1, %v515_v0  ;;  %v795_v1 = vld [vmem:[%s1333_s2 + $0xc8] sm:$0xff] }
 0x630   :  { %821 = vmatpush.msra.mxu1 %v795_v1 }
 0x631   :  { %v1256_v3 = vadd.f32 %v956_v31, %v646_v2  ;;  %v792_v31 = vld [vmem:[%s1333_s2 + $0xb0] sm:$0xff]  ;;  %v802_v2 = vld [vmem:[%s1333_s2 + $0xf8] sm:$0xff] }
 0x632   :  { %843 = vmatpush.msra.mxu2 %v792_v31  ;;  %869 = vmatpush.msra.mxu3 %v802_v2 }
 0x633   :  { %922 = vmatmul.msk.f32.gmra.mxu3 %vm24_vm0, %v1256_v3  ;;  %822 = vmatpush.msra.mxu1 %v794_v33 }
 0x634   :  { %844 = vmatpush.msra.mxu2 %v791_v60  ;;  %870 = vmatpush.msra.mxu3 %v801_v4 }
 0x636   :  { %845 = vmatpush.msra.mxu2 %v790_v36 }
 0x6ae   :  { %v684_v5 = vpop.f32.mrf.mxu3 }
 0x6af   :  { %v685_v6 = vadd.f32 %v957_v38, %v684_v5  ;;  %v789_v5 = vld [vmem:[%s1335_s1] sm:$0x3] }
 0x6b0   :  { %925 = vmatmul.msk.f32.vlgmr.msra.gmra.mxu1 %vm24_vm0, %v789_v5 }
 0x6b1   :  { %993 = vtanh.f32 %v685_v6  ;;  %v800_v6 = vld [vmem:[%s1333_s2 + $0xe8] sm:$0xff] }
 0x6b2   :  { %871 = vmatpush.msra.mxu3 %v800_v6 }
 0x6b6   :  { %v687_v7 = vpop.f32.mrf.mxu3 }
 0x6b7   :  { %v994_v8 = vpop.eup %993  ;;  %v688_v9 = vadd.f32 %v957_v38, %v687_v7 }
 0x6b8   :  { %923 = vmatmul.msk.f32.vlgmr.msra.gmra.mxu0 %vm24_vm0, %v994_v8 }
 0x6b9   :  { %995 = vtanh.f32 %v688_v9 }
 0x6bf   :  { %v996_v10 = vpop.eup %995 }
 0x6c0   :  { %924 = vmatmul.msk.f32.gmra.mxu0 %vm24_vm0, %v996_v10 }
 0x735   :  { %v716_v11 = vpop.f32.mrf.mxu0 }
 0x736   :  { %v717_v12 = vadd.f32 %v958_v63, %v716_v11 }
 0x738   :  { %v723_v13 = vsel %vm722_vm3, %v717_v12, -inf }
 0x739   :  { %v724_v14 = vrot.slane %v723_v13, 4 }
 0x73b   :  { %v725_v15 = vmax.f32 %v723_v13, %v724_v14 }
 0x73d   :  { %v726_v16 = vrot.slane %v725_v15, 2  ;;  %v719_v17 = vpop.f32.mrf.mxu0 }
 0x73e   :  { %v720_v18 = vadd.f32 %v958_v63, %v719_v17 }
 0x73f   :  { %v727_v20 = vmax.f32 %v725_v15, %v726_v16 }
 0x740   :  { %v755_v21 = vsel %vm722_vm3, %v720_v18, -inf }
 0x741   :  { %v728_v22 = vrot.slane %v727_v20, 1  ;;  %v756_v23 = vrot.slane %v755_v21, 4 }
 0x743   :  { %v729_v24 = vmax.f32 %v727_v20, %v728_v22  ;;  %v757_v25 = vmax.f32 %v755_v21, %v756_v23  ;;  %v824_v22 = vpop.f32.mrf.mxu1  ;;  %v959_v23 = vld [vmem:[%s1333_s2 + $0x155] ss:$0 sm:$0xff] }
 0x745   :  { %v730_v26 = vsub.f32 %v717_v12, %v729_v24  ;;  %v758_v27 = vrot.slane %v757_v25, 2 }
 0x747   :  { %v731_v28 = vmul.f32 1.442695, %v730_v26  ;;  %v759_v29 = vmax.f32 %v757_v25, %v758_v27 }
 0x749   :  { %997 = vpow2.f32 %v731_v28  ;;  %v760_v30 = vrot.slane %v759_v29, 1  ;;  %v960_v28 = vld [vmem:[%s1333_s2 + $0x156] ss:$0 sm:$0xff] }
 0x74b   :  { %v761_v32 = vmax.f32 %v759_v29, %v760_v30 }
 0x74d   :  { %v762_v34 = vsub.f32 %v720_v18, %v761_v32 }
 0x74f   :  { %v998_v35 = vpop.eup %997  ;;  %v763_v37 = vmul.f32 1.442695, %v762_v34 }
 0x750   :  { %v733_v39 = vsel %vm722_vm3, %v998_v35, 0.0 }
 0x751   :  { %v734_v40 = vrot.slane %v733_v39, 4  ;;  %999 = vpow2.f32 %v763_v37 }
 0x753   :  { %v735_v41 = vadd.f32 %v734_v40, %v733_v39 }
 0x755   :  { %v736_v42 = vrot.slane %v735_v41, 2 }
 0x757   :  { %v1000_v43 = vpop.eup %999  ;;  %v737_v44 = vadd.f32 %v736_v42, %v735_v41 }
 0x758   :  { %v765_v45 = vsel %vm722_vm3, %v1000_v43, 0.0 }
 0x759   :  { %v766_v46 = vrot.slane %v765_v45, 4  ;;  %v738_v47 = vrot.slane %v737_v44, 1 }
 0x75b   :  { %v767_v48 = vadd.f32 %v766_v46, %v765_v45  ;;  %v739_v49 = vadd.f32 %v738_v47, %v737_v44 }
 0x75d   :  { %v768_v50 = vrot.slane %v767_v48, 2  ;;  %1001 = vrcp.f32 %v739_v49 }
 0x75f   :  { %v769_v51 = vadd.f32 %v768_v50, %v767_v48 }
 0x761   :  { %v770_v52 = vrot.slane %v769_v51, 1 }
 0x763   :  { %v1002_v53 = vpop.eup %1001  ;;  %v771_v54 = vadd.f32 %v770_v52, %v769_v51 }
 0x764   :  { %v741_v55 = vmul.f32 %v1002_v53, %v998_v35 }
 0x765   :  { %1003 = vrcp.f32 %v771_v54 }
 0x766   :  { %744 = vperm.xlu1 %951, %v741_v55  }
 0x76b   :  { %v1004_v56 = vpop.eup %1003 }
 0x76c   :  { %v773_v57 = vmul.f32 %v1004_v56, %v1000_v43 }
 0x76e   :  { %776 = vperm.xlu2 %952, %v773_v57  }
 0x7c8   :  { %v777_v0 = vpop.permute.xlu2 %776 }
 0x7c9   :  { %v779_v38 = vmul.f32 %v777_v0, %v1256_v3 }
 0x7cb   :  { %v780_v7 = vsel %vm24_vm0, %v779_v38, 0.0 }
 0x7cc   :  { %v781_v8 = vrot.slane %v780_v7, 4 }
 0x7ce   :  { %v782_v9 = vadd.f32 %v781_v8, %v780_v7 }
 0x7d0   :  { %v783_v63 = vrot.slane %v782_v9, 2 }
 0x7d2   :  { %v784_v13 = vadd.f32 %v783_v63, %v782_v9 }
 0x7d4   :  { %v785_v16 = vrot.slane %v784_v13, 1 }
 0x7d6   :  { %v786_v19 = vadd.f32 %v785_v16, %v784_v13 }
 0x7d8   :  { %v745_v10 = vpop.permute.xlu1 %744 }
 0x7d9   :  { %v747_v3 = vmul.f32 %v745_v10, %v1251_v61  ;;  %v799_v61 = vld [vmem:[%s1333_s2 + $0xe0] sm:$0xff] }
 0x7da   :  { %872 = vmatpush.msra.mxu3 %v799_v61 }
 0x7db   :  { %v748_v11 = vsel %vm24_vm0, %v747_v3, 0.0 }
 0x7dc   :  { %v749_v12 = vrot.slane %v748_v11, 4 }
 0x7de   :  { %v750_v14 = vadd.f32 %v749_v12, %v748_v11 }
 0x7e0   :  { %v751_v15 = vrot.slane %v750_v14, 2 }
 0x7e2   :  { %v752_v17 = vadd.f32 %v751_v15, %v750_v14 }
 0x7e4   :  { %v753_v18 = vrot.slane %v752_v17, 1 }
 0x7e6   :  { %v754_v20 = vadd.f32 %v753_v18, %v752_v17 }
 0x7e8   :  { %v788_v21 = vsel %vm787_vm4, %v754_v20, %v786_v19 }
 0x7e9   :  { %926 = vmatmul.msk.f32.vlgmr.msra.gmra.mxu2 %vm24_vm0, %v788_v21 }
 0x86c   :  { %v847_v24 = vpop.f32.mrf.mxu2 }
 0x86d   :  { %v848_v25 = vadd.f32 %v847_v24, %v824_v22 }
 0x86f   :  { %v851_v26 = vadd.f32 %v959_v23, %v848_v25 }
 0x871   :  { %v852_v27 = vmax.f32 %v851_v26, 0.0 }
 0x873   :  { %927 = vmatmul.msk.f32.vlgmr.msra.gmra.mxu3 %vm24_vm0, %v852_v27 }
 0x8f6   :  { %v874_v29 = vpop.f32.mrf.mxu3 }
 0x8f7   :  { %v875_v30 = vadd.f32 %v960_v28, %v874_v29 }
 0x8f9   :  { %878 = vst.msk [vmem:[%s1336_s3] sm:$0x3] %vm877_vm5, %v875_v30 }

</bundles_post_ra>
